<compile_context>
chip_gen: v7x
topology: tpu7x:2x2x1
jax: 0.10.0
libtpu: 0.0.40
codegen_flags: <defaults>
</compile_context>

<pallas_src>
import math
from typing import NamedTuple

import jax
import jax.numpy as jnp
from jax import lax
from jax.experimental import pallas as pl
from jax.experimental.pallas import tpu as pltpu

_INV_SQRT2 = 1.0 / math.sqrt(2.0)
_SQRT_2_OVER_PI = math.sqrt(2.0 / math.pi)


def _make_kernel(approximate: bool):
    def kernel(x_ref, w_ref, b_ref, o_ref):
        # x_ref: (TN, Dp)   w_ref: (Dp, Dp) already in [in, out] (K x N) layout
        # b_ref: (1, Dp)    o_ref: (TN, Dp)
        y = lax.dot_general(
            x_ref[...], w_ref[...],
            dimension_numbers=(((1,), (0,)), ((), ())),   # x @ W_t, no in-kernel transpose
            preferred_element_type=jnp.float32,
        )
        # NOTE: for large D on v6e/v7x, casting both dot operands to bf16 (keeping
        # preferred_element_type=f32) gives 2-4x MXU throughput at some accuracy cost.
        y = y + b_ref[...].astype(jnp.float32)
        if approximate:
            # tanh-approx GELU: tanh uses the EUP slot -> far fewer VALU ops than erf.
            g = 0.5 * y * (1.0 + jnp.tanh(_SQRT_2_OVER_PI * (y + 0.044715 * y * y * y)))
        else:
            # exact (erf-based) GELU, matching torch.nn.GELU(approximate='none')
            g = 0.5 * y * (1.0 + lax.erf(y * _INV_SQRT2))
        # Residual: re-load x from VMEM here rather than holding the tile in vregs
        # across the matmul (a 512x128 f32 tile would be the whole register file).
        o_ref[...] = (x_ref[...].astype(jnp.float32) + g).astype(o_ref.dtype)
    return kernel


def _vmem_cap_bytes():
    phys = 64 << 20                     # conservative default (v7x per-TC VMEM)
    try:
        info = pltpu.get_tpu_info()
        phys = int(getattr(info, "vmem_capacity_bytes", phys))
    except Exception:
        pass
    # leave headroom for Mosaic internal scratch: ~48 MiB on v7x, ~96 MiB on v5e/v6e
    return min(int(phys * 3 // 4), 100 << 20)


def _choose_row_tile(n, dp, itemsize, cap_bytes, w_bytes,
                     target_tile_bytes=2 << 20, max_rows=8192):
    if n <= 8:
        return n                                           # single full-extent block
    # rows whose double-buffered x+out tiles fit the remaining VMEM budget
    avail = max(cap_bytes - w_bytes - (8 << 20), 1 << 20)
    tn_vmem = max(8, (avail // (4 * dp * itemsize)) // 8 * 8)
    # ~2 MiB per tile so the ~0.35us per-grid-step overhead is negligible vs HBM traffic
    tn_tgt = max(8, (target_tile_bytes // (dp * itemsize)) // 8 * 8)
    # guarantee >= 2 grid steps so both v7x TensorCores get work
    half8 = -(-((n + 1) // 2) // 8) * 8
    return int(max(8, min(tn_tgt, tn_vmem, half8, max_rows)))


def _block_2d(x2, w_t, bias2, *, approximate=False):
    """x2: [N, Dp]; w_t: [Dp, Dp] in [in, out] layout; bias2: [1, Dp]."""
    n, dp = x2.shape
    itemsize = jnp.dtype(x2.dtype).itemsize
    w_bytes = 2 * dp * dp * jnp.dtype(w_t.dtype).itemsize   # conservatively double-buffered
    cap = _vmem_cap_bytes()
    tn = _choose_row_tile(n, dp, itemsize, cap, w_bytes)
    grid = (pl.cdiv(n, tn),)

    need = (w_bytes
            + 4 * dp * jnp.dtype(bias2.dtype).itemsize
            + 4 * tn * dp * itemsize                        # x & out tiles, double-buffered
            + (8 << 20))                                    # Mosaic internal scratch headroom
    vmem_limit = int(min(max(need, 16 << 20), cap))

    def build(single_buffer_resident):
        if single_buffer_resident:
            # constant index_map => one buffer is enough; double-buffering wastes VMEM
            w_spec = pl.BlockSpec((dp, dp), lambda i: (0, 0), pipeline_mode=pl.Buffered(1))
            b_spec = pl.BlockSpec((1, dp), lambda i: (0, 0), pipeline_mode=pl.Buffered(1))
        else:
            w_spec = pl.BlockSpec((dp, dp), lambda i: (0, 0))
            b_spec = pl.BlockSpec((1, dp), lambda i: (0, 0))
        return pl.pallas_call(
            _make_kernel(approximate),
            out_shape=jax.ShapeDtypeStruct((n, dp), x2.dtype),
            grid=grid,
            in_specs=[
                pl.BlockSpec((tn, dp), lambda i: (i, 0)),   # streamed row tiles
                w_spec,                                     # resident weight
                b_spec,                                     # resident bias
            ],
            out_specs=pl.BlockSpec((tn, dp), lambda i: (i, 0)),
            compiler_params=pltpu.CompilerParams(
                dimension_semantics=("parallel",),          # shard row tiles across TCs
                vmem_limit_bytes=vmem_limit,
            ),
        )(x2, w_t, bias2)

    try:
        return build(True)
    except Exception:
        # pipeline_mode / pl.Buffered(1) unsupported on this jax version: default buffering.
        return build(False)


class BlockParams(NamedTuple):
    w_t: jax.Array    # [p*d, p*d]: kron(I_p, W.T) when packed, else W.T
    bias: jax.Array   # [1, p*d]
    d: int
    p: int


def prepare_block_params(weight, bias, *, lane_width=128):
    """Pack the nn.Linear parameters ONCE (at init). Reuse the result every forward."""
    d = weight.shape[0]
    p = lane_width // d if (d < lane_width and lane_width % d == 0) else 1
    w_t = jnp.asarray(weight).T                               # MXU-native [in, out] layout
    b = jnp.asarray(bias)
    if p > 1:
        # lane-dense packing: p feature groups per 128-lane row, block-diagonal weight
        w_t = jnp.kron(jnp.eye(p, dtype=w_t.dtype), w_t)      # [p*d, p*d]
        b = jnp.tile(b, p)
    return BlockParams(w_t=w_t, bias=b.reshape(1, -1), d=d, p=p)


def block_apply(x, params: BlockParams, *, approximate=False):
    """Block.forward: x + GELU(x @ W^T + b) for x[..., d] (Linear acts on last dim)."""
    d, p = params.d, params.p
    orig_shape = x.shape
    x2 = x.reshape(-1, d)
    n = x2.shape[0]
    if p > 1 and n % p == 0:
        # free reshape [N, d] -> [N/p, p*d]: unmasked 128-lane stores, full MXU lanes
        out = _block_2d(x2.reshape(n // p, p * d), params.w_t, params.bias,
                        approximate=approximate).reshape(n, d)
    else:
        # unpacked fallback (< 128-lane masked stores) -- correct, just slower
        out = _block_2d(x2, params.w_t[:d, :d], params.bias[:, :d],
                        approximate=approximate)
    return out.reshape(orig_shape)


def block_forward(x, weight, bias, *, approximate=False):
    """One-shot convenience wrapper. For repeated calls, prepare_block_params() once."""
    return block_apply(x, prepare_block_params(weight, bias), approximate=approximate)


if __name__ == "__main__":
    size = 32                      # Block(size=32)
    key = jax.random.PRNGKey(0)
    kx, kw, kb, k2, k3 = jax.random.split(key, 5)

    # nn.Linear-shaped parameters: W [out, in], b [out]
    bound = 1.0 / math.sqrt(size)
    weight = jax.random.uniform(kw, (size, size), jnp.float32, -bound, bound)
    bias = jax.random.uniform(kb, (size,), jnp.float32, -bound, bound)

    # hoisted per-module preparation (transpose + kron + tile done once, reused)
    params = prepare_block_params(weight, bias)

    def ref_fn(x):
        y = x @ weight.T + bias
        return x + 0.5 * y * (1.0 + lax.erf(y / math.sqrt(2.0)))   # exact erf GELU

    # three cases: packed single block, packed multi-step grid with a padded last
    # block (n % tn != 0), and the unpacked fallback (n % p != 0)
    for shape, k in (((2, 8, size), kx), ((3, 24, size), k2), ((1, 10, size), k3)):
        x = jax.random.normal(k, shape, jnp.float32)
        out = jax.block_until_ready(block_apply(x, params))
        assert out.shape == x.shape
        assert jnp.allclose(out, ref_fn(x), atol=1e-5, rtol=1e-5), f"mismatch at {shape}"

    print("KERNEL_OK")
</pallas_src>

<mosaic_0001>
module attributes {stable_mosaic.version = 11 : i64} {
  func.func @kernel(%arg0: i32, %arg1: memref<4x128xf32, #tpu.memory_space<vmem>>, %arg2: memref<128x128xf32, #tpu.memory_space<vmem>>, %arg3: memref<1x128xf32, #tpu.memory_space<vmem>>, %arg4: memref<4x128xf32, #tpu.memory_space<vmem>>) attributes {dimension_semantics = [#tpu.dimension_semantics<parallel>], iteration_bounds = array<i64: 1>, scalar_prefetch = 0 : i64, scratch_operands = 0 : i64, tpu.core_type = #tpu.core_type<tc>, window_params = [{transform_indices = @transform_0, window_bounds = array<i64: 4, 128>}, {pipeline_mode = #tpu.pipeline_mode<synchronous>, transform_indices = @transform_1, window_bounds = array<i64: 128, 128>}, {pipeline_mode = #tpu.pipeline_mode<synchronous>, transform_indices = @transform_2, window_bounds = array<i64: 1, 128>}, {transform_indices = @transform_3, window_bounds = array<i64: 4, 128>}]} {
    %c0 = arith.constant 0 : index
    %c0_0 = arith.constant 0 : index
    %0 = vector.load %arg1[%c0, %c0_0] : memref<4x128xf32, #tpu.memory_space<vmem>>, vector<4x128xf32>
    %c0_1 = arith.constant 0 : index
    %c0_2 = arith.constant 0 : index
    %1 = vector.load %arg2[%c0_1, %c0_2] : memref<128x128xf32, #tpu.memory_space<vmem>>, vector<128x128xf32>
    %cst = arith.constant dense<0.000000e+00> : vector<4x128xf32>
    %2 = tpu.matmul %0, %1, %cst {dimension_numbers = #tpu.dot_dimension_numbers<[1], [0], [0], [1], [0, 0, 1, 1], [], []>} : vector<4x128xf32>, vector<128x128xf32>, vector<4x128xf32> -> vector<4x128xf32>
    %c0_3 = arith.constant 0 : index
    %c0_4 = arith.constant 0 : index
    %3 = vector.load %arg3[%c0_3, %c0_4] : memref<1x128xf32, #tpu.memory_space<vmem>>, vector<1x128xf32>
    %4 = vector.broadcast %3 : vector<1x128xf32> to vector<4x128xf32>
    %5 = arith.addf %2, %4 : vector<4x128xf32>
    %cst_5 = arith.constant 5.000000e-01 : f32
    %6 = vector.broadcast %cst_5 : f32 to vector<4x128xf32>
    %7 = arith.mulf %6, %5 : vector<4x128xf32>
    %cst_6 = arith.constant 0.707106769 : f32
    %8 = vector.broadcast %cst_6 : f32 to vector<4x128xf32>
    %9 = arith.mulf %5, %8 : vector<4x128xf32>
    %10 = math.erf %9 : vector<4x128xf32>
    %cst_7 = arith.constant 1.000000e+00 : f32
    %11 = vector.broadcast %cst_7 : f32 to vector<4x128xf32>
    %12 = arith.addf %11, %10 : vector<4x128xf32>
    %13 = arith.mulf %7, %12 : vector<4x128xf32>
    %c0_8 = arith.constant 0 : index
    %c0_9 = arith.constant 0 : index
    %14 = vector.load %arg1[%c0_8, %c0_9] : memref<4x128xf32, #tpu.memory_space<vmem>>, vector<4x128xf32>
    %15 = arith.addf %14, %13 : vector<4x128xf32>
    %c0_10 = arith.constant 0 : index
    %c0_11 = arith.constant 0 : index
    %16 = vector.load %arg4[%c0_10, %c0_11] : memref<4x128xf32, #tpu.memory_space<vmem>>, vector<4x128xf32>
    tpu.vector_store %arg4[%c0_10, %c0_11], %15 {strides = array<i32>} : memref<4x128xf32, #tpu.memory_space<vmem>>, vector<4x128xf32>,
    return
  }
  func.func @transform_0(%arg0: i32) -> (i32, i32) {
    %c0_i32 = arith.constant 0 : i32
    %c0_i32_0 = arith.constant 0 : i32
    return %arg0, %c0_i32 : i32, i32
  }
  func.func @transform_1(%arg0: i32) -> (i32, i32) {
    %c0_i32 = arith.constant 0 : i32
    %c0_i32_0 = arith.constant 0 : i32
    %c0_i32_1 = arith.constant 0 : i32
    return %c0_i32, %c0_i32_0 : i32, i32
  }
  func.func @transform_2(%arg0: i32) -> (i32, i32) {
    %c0_i32 = arith.constant 0 : i32
    %c0_i32_0 = arith.constant 0 : i32
    %c0_i32_1 = arith.constant 0 : i32
    return %c0_i32, %c0_i32_0 : i32, i32
  }
  func.func @transform_3(%arg0: i32) -> (i32, i32) {
    %c0_i32 = arith.constant 0 : i32
    %c0_i32_0 = arith.constant 0 : i32
    return %arg0, %c0_i32 : i32, i32
  }
}

module attributes {stable_mosaic.version = 11 : i64} {
  func.func @kernel(%arg0: i32, %arg1: memref<4x128xf32, #tpu.memory_space<vmem>>, %arg2: memref<128x128xf32, #tpu.memory_space<vmem>>, %arg3: memref<1x128xf32, #tpu.memory_space<vmem>>, %arg4: memref<4x128xf32, #tpu.memory_space<vmem>>) attributes {dimension_semantics = [#tpu.dimension_semantics<parallel>], iteration_bounds = array<i64: 1>, scalar_prefetch = 0 : i64, scratch_operands = 0 : i64, tpu.core_type = #tpu.core_type<tc>, window_params = [{transform_indices = @transform_0, window_bounds = array<i64: 4, 128>}, {pipeline_mode = #tpu.pipeline_mode<synchronous>, transform_indices = @transform_1, window_bounds = array<i64: 128, 128>}, {pipeline_mode = #tpu.pipeline_mode<synchronous>, transform_indices = @transform_2, window_bounds = array<i64: 1, 128>}, {transform_indices = @transform_3, window_bounds = array<i64: 4, 128>}]} {
    %c0 = arith.constant 0 : index
    %c0_0 = arith.constant 0 : index
    %0 = vector.load %arg1[%c0, %c0_0] : memref<4x128xf32, #tpu.memory_space<vmem>>, vector<4x128xf32>
    %c0_1 = arith.constant 0 : index
    %c0_2 = arith.constant 0 : index
    %1 = vector.load %arg2[%c0_1, %c0_2] : memref<128x128xf32, #tpu.memory_space<vmem>>, vector<128x128xf32>
    %cst = arith.constant dense<0.000000e+00> : vector<4x128xf32>
    %2 = tpu.matmul %0, %1, %cst {dimension_numbers = #tpu.dot_dimension_numbers<[1], [0], [0], [1], [0, 0, 1, 1], [], []>} : vector<4x128xf32>, vector<128x128xf32>, vector<4x128xf32> -> vector<4x128xf32>
    %c0_3 = arith.constant 0 : index
    %c0_4 = arith.constant 0 : index
    %3 = vector.load %arg3[%c0_3, %c0_4] : memref<1x128xf32, #tpu.memory_space<vmem>>, vector<1x128xf32>
    %4 = vector.broadcast %3 : vector<1x128xf32> to vector<4x128xf32>
    %5 = arith.addf %2, %4 : vector<4x128xf32>
    %cst_5 = arith.constant 5.000000e-01 : f32
    %6 = vector.broadcast %cst_5 : f32 to vector<4x128xf32>
    %7 = arith.mulf %6, %5 : vector<4x128xf32>
    %cst_6 = arith.constant 0.707106769 : f32
    %8 = vector.broadcast %cst_6 : f32 to vector<4x128xf32>
    %9 = arith.mulf %5, %8 : vector<4x128xf32>
    %10 = math.erf %9 : vector<4x128xf32>
    %cst_7 = arith.constant 1.000000e+00 : f32
    %11 = vector.broadcast %cst_7 : f32 to vector<4x128xf32>
    %12 = arith.addf %11, %10 : vector<4x128xf32>
    %13 = arith.mulf %7, %12 : vector<4x128xf32>
    %c0_8 = arith.constant 0 : index
    %c0_9 = arith.constant 0 : index
    %14 = vector.load %arg1[%c0_8, %c0_9] : memref<4x128xf32, #tpu.memory_space<vmem>>, vector<4x128xf32>
    %15 = arith.addf %14, %13 : vector<4x128xf32>
    %c0_10 = arith.constant 0 : index
    %c0_11 = arith.constant 0 : index
    %16 = vector.load %arg4[%c0_10, %c0_11] : memref<4x128xf32, #tpu.memory_space<vmem>>, vector<4x128xf32>
    tpu.vector_store %arg4[%c0_10, %c0_11], %15 {strides = array<i32>} : memref<4x128xf32, #tpu.memory_space<vmem>>, vector<4x128xf32>,
    return
  }
  func.func @transform_0(%arg0: i32) -> (i32, i32) {
    %c0_i32 = arith.constant 0 : i32
    %c0_i32_0 = arith.constant 0 : i32
    return %arg0, %c0_i32 : i32, i32
  }
  func.func @transform_1(%arg0: i32) -> (i32, i32) {
    %c0_i32 = arith.constant 0 : i32
    %c0_i32_0 = arith.constant 0 : i32
    %c0_i32_1 = arith.constant 0 : i32
    return %c0_i32, %c0_i32_0 : i32, i32
  }
  func.func @transform_2(%arg0: i32) -> (i32, i32) {
    %c0_i32 = arith.constant 0 : i32
    %c0_i32_0 = arith.constant 0 : i32
    %c0_i32_1 = arith.constant 0 : i32
    return %c0_i32, %c0_i32_0 : i32, i32
  }
  func.func @transform_3(%arg0: i32) -> (i32, i32) {
    %c0_i32 = arith.constant 0 : i32
    %c0_i32_0 = arith.constant 0 : i32
    return %arg0, %c0_i32 : i32, i32
  }
}

</mosaic_0001>

<bundles_post_ra>
// kernel: tpu_custom_call.1
= control target key start
LH: loop header
LB: loop body
LE: loop exit
PB: predicated region body
PF: predicated region fallthrough
CT: control target
= control target key end

     0   :  { %8 = vsyncpa [#allocation3], 0  ;;  %s391_s0 = inlined_call_operand.hbm [shape: f32[4,128], index: 0, kind: input, shape index: {}]   ;;  %s392_s1 = inlined_call_operand.hbm [shape: f32[128,128], index: 1, kind: input, shape index: {}]   ;;  %s393_s2 = inlined_call_operand.vmem [shape: f32[1,128], index: 2, kind: input, shape index: {}]   ;;  %s394_s3 = inlined_call_operand.hbm [shape: f32[4,128], index: 3, kind: output, shape index: {}]  }
   0x1   :  { %9 = vsyncpa [#allocation6], 0 }
   0x2   :  { %10 = vsyncpa [#allocation4], 0  ;;  %s317_s12 = smov [#allocation2]   ;;  %s318_s14 = smov [#allocation5]  }
   0x3   :  { %s17_s13 = sshll.u32 %s317_s12, 4  ;;  %s26_s15 = sshll.u32 %s318_s14, 4  ;;  %s18_s13 = int_to_ptr.vmem [resolvable:$true] %s17_s13  ;;  %s345_s15 = int_to_ptr.vmem [resolvable:$true] %s26_s15 }
   0x4   :  { %s245_s18 = scalar_lea.hbm %s391_s0, 64 }
   0x5   :  { %p246_p0 = scmp.ne.s32.totalorder %s391_s0, %s245_s18  ;;  %p249_p1 = scmp.lt.u32.totalorder %s245_s18, %s391_s0 }
   0x7   :  { %p251_p2 = pnand %p249_p1, %p246_p0 }
   0x9   :  { %254 = shalt.err (!%p251_p2)
}
   0xa   :  { %s255_s23 = scalar_lea.vmem %s18_s13, 64  ;;  %p260_p4 = scmp.lt.s32.totalorder %s18_s13, %s18_s13 }
   0xb   :  { %p256_p3 = scmp.ne.s32.totalorder %s18_s13, %s255_s23  ;;  %p261_p5 = scmp.lt.s32.totalorder %s255_s23, %s255_s23 }
   0xd   :  { %p262_p6 = por %p261_p5, %p260_p4 }
   0xf   :  { %p263_p7 = pnand %p262_p6, %p256_p3 }
  0x11   :  { %266 = shalt.err (!%p263_p7)
}
  0x12   :  { %20 = dma.hbm_to_vmem [thread:$0]  %s391_s0, 64, %s18_s13, [#allocation3]  }
  0x13   :  { %s267_s28 = scalar_lea.hbm %s392_s1, 2048 }
  0x14   :  { %p268_p8 = scmp.ne.s32.totalorder %s392_s1, %s267_s28  ;;  %p271_p9 = scmp.lt.u32.totalorder %s267_s28, %s392_s1 }
  0x16   :  { %p273_p10 = pnand %p271_p9, %p268_p8 }
  0x18   :  { %276 = shalt.err (!%p273_p10)
}
  0x19   :  { %s277_s6 = scalar_lea.vmem %s345_s15, 2048  ;;  %p282_p12 = scmp.lt.s32.totalorder %s345_s15, %s345_s15 }
  0x1a   :  { %p278_p11 = scmp.ne.s32.totalorder %s345_s15, %s277_s6  ;;  %p283_p13 = scmp.lt.s32.totalorder %s277_s6, %s277_s6 }
  0x1c   :  { %p284_p0 = por %p283_p13, %p282_p12 }
  0x1e   :  { %p285_p1 = pnand %p284_p0, %p278_p11 }
  0x20   :  { %288 = shalt.err (!%p285_p1)
}
  0x21   :  { %s319_s0 = smov 128   ;;  %s320_s7 = smov 8  }
  0x22   :  { %32 = dma.hbm_to_vmem [thread:$0]  %s392_s1, 2048, %s345_s15, [#allocation6], %s319_s0, %s319_s0, %s320_s7  }
  0x23   :  { %311 = dma.done.wait [#allocation3], 64  }
  0x24   :  { %312 = vsyncadd [#allocation3], 4294967232 }
  0x25   :  { %313 = dma.done.wait [#allocation6], 2048  }
  0x26   :  { %314 = vsyncadd [#allocation6], 4294965248  ;;  %v321_v0 = vmov 0.0|0.0   ;;  %vm322_vm0 = vmmov 0   ;;  %v323_v1 = vmov 0.0   ;;  %v42_v2 = vld [vmem:[#allocation5] sm:$0xff] }
  0x27   :  { %211 = vmatprep.subr.bf16.mxu0 %v321_v0  ;;  %208 = vmatprep.mubr.msk.f32.mxu0 %vm322_vm0, %v323_v1  ;;  %v43_v3 = vld [vmem:[#allocation5 + $0x8] sm:$0xff]  ;;  %v44_v4 = vld [vmem:[#allocation5 + $0x10] sm:$0xff]  ;;  %v45_v6 = vld [vmem:[#allocation5 + $0x18] sm:$0xff]  ;;  %s324_s11 = smov [#allocation7]  }
  0x28   :  { %v212_v5 = vpack.c.bf16 %v43_v3, %v42_v2  ;;  %v215_v7 = vpack.c.bf16 %v45_v6, %v44_v4  ;;  %v46_v8 = vld [vmem:[#allocation5 + $0x20] sm:$0xff]  ;;  %v47_v9 = vld [vmem:[#allocation5 + $0x28] sm:$0xff]  ;;  %v48_v11 = vld [vmem:[#allocation5 + $0x30] sm:$0xff]  ;;  %s148_s12 = sshll.u32 %s324_s11, 4  ;;  %s149_s12 = int_to_ptr.vmem [resolvable:$true] %s148_s12 }
  0x29   :  { %v218_v10 = vpack.c.bf16 %v47_v9, %v46_v8  ;;  %v49_v12 = vld [vmem:[#allocation5 + $0x38] sm:$0xff]  ;;  %v50_v14 = vld [vmem:[#allocation5 + $0x40] sm:$0xff]  ;;  %v51_v15 = vld [vmem:[#allocation5 + $0x48] sm:$0xff]  ;;  %s289_s13 = scalar_lea.vmem %s149_s12, 64  ;;  %p294_p3 = scmp.lt.s32.totalorder %s149_s12, %s149_s12 }
  0x2a   :  { %213 = vmatpush3.bf16.msra.mxu0 %v212_v5  ;;  %v221_v13 = vpack.c.bf16 %v49_v12, %v48_v11  ;;  %v224_v16 = vpack.c.bf16 %v51_v15, %v50_v14  ;;  %v52_v17 = vld [vmem:[#allocation5 + $0x50] sm:$0xff]  ;;  %v53_v18 = vld [vmem:[#allocation5 + $0x58] sm:$0xff]  ;;  %v54_v20 = vld [vmem:[#allocation5 + $0x60] sm:$0xff]  ;;  %p290_p2 = scmp.ne.s32.totalorder %s149_s12, %s289_s13  ;;  %p295_p4 = scmp.lt.s32.totalorder %s289_s13, %s289_s13 }
  0x2b   :  { %214 = vmatprep.subr.bf16.mxu0 %v321_v0  ;;  %v227_v19 = vpack.c.bf16 %v53_v18, %v52_v17  ;;  %v55_v21 = vld [vmem:[#allocation5 + $0x68] sm:$0xff]  ;;  %v56_v23 = vld [vmem:[#allocation5 + $0x70] sm:$0xff]  ;;  %v57_v24 = vld [vmem:[#allocation5 + $0x78] sm:$0xff] }
  0x2c   :  { %v230_v22 = vpack.c.bf16 %v55_v21, %v54_v20  ;;  %v233_v25 = vpack.c.bf16 %v57_v24, %v56_v23  ;;  %v41_v26 = vld [vmem:[#allocation2] sm:$0xf]  ;;  %p296_p5 = por %p295_p4, %p294_p3 }
  0x2d   :  { %v158_v27 = vld [vmem:[%s393_s2] ss:$0 sm:$0xff] }
  0x2e   :  { %216 = vmatpush3.bf16.msra.mxu0 %v215_v7  ;;  %p297_p6 = pnand %p296_p5, %p290_p2 }
  0x2f   :  { %217 = vmatprep.subr.bf16.mxu0 %v321_v0 }
  0x32   :  { %219 = vmatpush3.bf16.msra.mxu0 %v218_v10 }
  0x33   :  { %220 = vmatprep.subr.bf16.mxu0 %v321_v0 }
  0x36   :  { %222 = vmatpush3.bf16.msra.mxu0 %v221_v13 }
  0x37   :  { %223 = vmatprep.subr.bf16.mxu0 %v321_v0 }
  0x3a   :  { %225 = vmatpush3.bf16.msra.mxu0 %v224_v16 }
  0x3b   :  { %226 = vmatprep.subr.bf16.mxu0 %v321_v0 }
  0x3e   :  { %228 = vmatpush3.bf16.msra.mxu0 %v227_v19 }
  0x3f   :  { %229 = vmatprep.subr.bf16.mxu0 %v321_v0 }
  0x42   :  { %231 = vmatpush3.bf16.msra.mxu0 %v230_v22 }
  0x43   :  { %232 = vmatprep.subr.bf16.mxu0 %v321_v0 }
  0x46   :  { %234 = vmatpush3.bf16.msra.mxu0 %v233_v25 }
  0x49   :  { %209 = vmatmul.mubr.f32.vlgmr.msra.gmra.mrb[0].mxu0 %v41_v26 }
 0x11c   :  { %v131_v28 = vpop.f32.mrb[0].mxu0 }
 0x11d   :  { %v132_v29 = vadd.f32 %v158_v27, %v131_v28  ;;  %v210_v30 = vpop.f32.mrb[1].mxu0 }
 0x11f   :  { %v136_v31 = vmul.f32 0.70710677, %v132_v29  ;;  %v135_v33 = vmul.f32 0.5, %v132_v29 }
 0x121   :  { %243 = verf.f32 %v136_v31 }
 0x12b   :  { %v244_v32 = vpop.eup %243 }
 0x12c   :  { %v138_v34 = vadd.f32 1.0, %v244_v32 }
 0x12e   :  { %v139_v35 = vmul.f32 %v138_v34, %v135_v33 }
 0x130   :  { %v140_v36 = vadd.f32 %v139_v35, %v41_v26 }
 0x132   :  { %141 = vst [vmem:[#allocation7] sm:$0xf] %v140_v36 }
 0x133   :  { %300 = shalt.err (!%p297_p6)
}
 0x134   :  { %s301_s15 = scalar_lea.hbm %s394_s3, 64 }
 0x135   :  { %p302_p7 = scmp.ne.s32.totalorder %s394_s3, %s301_s15  ;;  %p305_p8 = scmp.lt.u32.totalorder %s301_s15, %s394_s3 }
 0x137   :  { %p307_p9 = pnand %p305_p8, %p302_p7 }
 0x139   :  { %310 = shalt.err (!%p307_p9)
}
 0x13a   :  { %151 = dma.vmem_to_hbm [thread:$0]  %s149_s12, 64, %s394_s3, [#allocation4]  }
 0x13b   :  { %315 = dma.done.wait [#allocation4], 64  }
 0x13c   :  { %316 = vsyncadd [#allocation4], 4294967232 }
 0x13d   :  { %155 = vsyncpa [#allocation3], 1 }
 0x13e   :  { %156 = vsyncpa [#allocation6], 1 }
 0x13f   :  { %157 = vsyncpa [#allocation4], 1 }

// kernel: tpu_custom_call.1
= control target key start
LH: loop header
LB: loop body
LE: loop exit
PB: predicated region body
PF: predicated region fallthrough
CT: control target
= control target key end

     0   :  { %8 = vsyncpa [#allocation3], 0  ;;  %s391_s0 = inlined_call_operand.hbm [shape: f32[4,128], index: 0, kind: input, shape index: {}]   ;;  %s392_s1 = inlined_call_operand.hbm [shape: f32[128,128], index: 1, kind: input, shape index: {}]   ;;  %s393_s2 = inlined_call_operand.vmem [shape: f32[1,128], index: 2, kind: input, shape index: {}]   ;;  %s394_s3 = inlined_call_operand.hbm [shape: f32[4,128], index: 3, kind: output, shape index: {}]  }
   0x1   :  { %9 = vsyncpa [#allocation6], 0 }
   0x2   :  { %10 = vsyncpa [#allocation4], 0  ;;  %s317_s12 = smov [#allocation2]   ;;  %s318_s14 = smov [#allocation5]  }
   0x3   :  { %s17_s13 = sshll.u32 %s317_s12, 4  ;;  %s26_s15 = sshll.u32 %s318_s14, 4  ;;  %s18_s13 = int_to_ptr.vmem [resolvable:$true] %s17_s13  ;;  %s345_s15 = int_to_ptr.vmem [resolvable:$true] %s26_s15 }
   0x4   :  { %s245_s18 = scalar_lea.hbm %s391_s0, 64 }
   0x5   :  { %p246_p0 = scmp.ne.s32.totalorder %s391_s0, %s245_s18  ;;  %p249_p1 = scmp.lt.u32.totalorder %s245_s18, %s391_s0 }
   0x7   :  { %p251_p2 = pnand %p249_p1, %p246_p0 }
   0x9   :  { %254 = shalt.err (!%p251_p2)
}
   0xa   :  { %s255_s23 = scalar_lea.vmem %s18_s13, 64  ;;  %p260_p4 = scmp.lt.s32.totalorder %s18_s13, %s18_s13 }
   0xb   :  { %p256_p3 = scmp.ne.s32.totalorder %s18_s13, %s255_s23  ;;  %p261_p5 = scmp.lt.s32.totalorder %s255_s23, %s255_s23 }
   0xd   :  { %p262_p6 = por %p261_p5, %p260_p4 }
   0xf   :  { %p263_p7 = pnand %p262_p6, %p256_p3 }
  0x11   :  { %266 = shalt.err (!%p263_p7)
}
  0x12   :  { %20 = dma.hbm_to_vmem [thread:$0]  %s391_s0, 64, %s18_s13, [#allocation3]  }
  0x13   :  { %s267_s28 = scalar_lea.hbm %s392_s1, 2048 }
  0x14   :  { %p268_p8 = scmp.ne.s32.totalorder %s392_s1, %s267_s28  ;;  %p271_p9 = scmp.lt.u32.totalorder %s267_s28, %s392_s1 }
  0x16   :  { %p273_p10 = pnand %p271_p9, %p268_p8 }
  0x18   :  { %276 = shalt.err (!%p273_p10)
}
  0x19   :  { %s277_s6 = scalar_lea.vmem %s345_s15, 2048  ;;  %p282_p12 = scmp.lt.s32.totalorder %s345_s15, %s345_s15 }
  0x1a   :  { %p278_p11 = scmp.ne.s32.totalorder %s345_s15, %s277_s6  ;;  %p283_p13 = scmp.lt.s32.totalorder %s277_s6, %s277_s6 }
  0x1c   :  { %p284_p0 = por %p283_p13, %p282_p12 }
  0x1e   :  { %p285_p1 = pnand %p284_p0, %p278_p11 }
  0x20   :  { %288 = shalt.err (!%p285_p1)
}
  0x21   :  { %s319_s0 = smov 128   ;;  %s320_s7 = smov 8  }
  0x22   :  { %32 = dma.hbm_to_vmem [thread:$0]  %s392_s1, 2048, %s345_s15, [#allocation6], %s319_s0, %s319_s0, %s320_s7  }
  0x23   :  { %311 = dma.done.wait [#allocation3], 64  }
  0x24   :  { %312 = vsyncadd [#allocation3], 4294967232 }
  0x25   :  { %313 = dma.done.wait [#allocation6], 2048  }
  0x26   :  { %314 = vsyncadd [#allocation6], 4294965248  ;;  %v321_v0 = vmov 0.0|0.0   ;;  %vm322_vm0 = vmmov 0   ;;  %v323_v1 = vmov 0.0   ;;  %v42_v2 = vld [vmem:[#allocation5] sm:$0xff] }
  0x27   :  { %211 = vmatprep.subr.bf16.mxu0 %v321_v0  ;;  %208 = vmatprep.mubr.msk.f32.mxu0 %vm322_vm0, %v323_v1  ;;  %v43_v3 = vld [vmem:[#allocation5 + $0x8] sm:$0xff]  ;;  %v44_v4 = vld [vmem:[#allocation5 + $0x10] sm:$0xff]  ;;  %v45_v6 = vld [vmem:[#allocation5 + $0x18] sm:$0xff]  ;;  %s324_s11 = smov [#allocation7]  }
  0x28   :  { %v212_v5 = vpack.c.bf16 %v43_v3, %v42_v2  ;;  %v215_v7 = vpack.c.bf16 %v45_v6, %v44_v4  ;;  %v46_v8 = vld [vmem:[#allocation5 + $0x20] sm:$0xff]  ;;  %v47_v9 = vld [vmem:[#allocation5 + $0x28] sm:$0xff]  ;;  %v48_v11 = vld [vmem:[#allocation5 + $0x30] sm:$0xff]  ;;  %s148_s12 = sshll.u32 %s324_s11, 4  ;;  %s149_s12 = int_to_ptr.vmem [resolvable:$true] %s148_s12 }
  0x29   :  { %v218_v10 = vpack.c.bf16 %v47_v9, %v46_v8  ;;  %v49_v12 = vld [vmem:[#allocation5 + $0x38] sm:$0xff]  ;;  %v50_v14 = vld [vmem:[#allocation5 + $0x40] sm:$0xff]  ;;  %v51_v15 = vld [vmem:[#allocation5 + $0x48] sm:$0xff]  ;;  %s289_s13 = scalar_lea.vmem %s149_s12, 64  ;;  %p294_p3 = scmp.lt.s32.totalorder %s149_s12, %s149_s12 }
  0x2a   :  { %213 = vmatpush3.bf16.msra.mxu0 %v212_v5  ;;  %v221_v13 = vpack.c.bf16 %v49_v12, %v48_v11  ;;  %v224_v16 = vpack.c.bf16 %v51_v15, %v50_v14  ;;  %v52_v17 = vld [vmem:[#allocation5 + $0x50] sm:$0xff]  ;;  %v53_v18 = vld [vmem:[#allocation5 + $0x58] sm:$0xff]  ;;  %v54_v20 = vld [vmem:[#allocation5 + $0x60] sm:$0xff]  ;;  %p290_p2 = scmp.ne.s32.totalorder %s149_s12, %s289_s13  ;;  %p295_p4 = scmp.lt.s32.totalorder %s289_s13, %s289_s13 }
  0x2b   :  { %214 = vmatprep.subr.bf16.mxu0 %v321_v0  ;;  %v227_v19 = vpack.c.bf16 %v53_v18, %v52_v17  ;;  %v55_v21 = vld [vmem:[#allocation5 + $0x68] sm:$0xff]  ;;  %v56_v23 = vld [vmem:[#allocation5 + $0x70] sm:$0xff]  ;;  %v57_v24 = vld [vmem:[#allocation5 + $0x78] sm:$0xff] }
  0x2c   :  { %v230_v22 = vpack.c.bf16 %v55_v21, %v54_v20  ;;  %v233_v25 = vpack.c.bf16 %v57_v24, %v56_v23  ;;  %v41_v26 = vld [vmem:[#allocation2] sm:$0xf]  ;;  %p296_p5 = por %p295_p4, %p294_p3 }
  0x2d   :  { %v158_v27 = vld [vmem:[%s393_s2] ss:$0 sm:$0xff] }
  0x2e   :  { %216 = vmatpush3.bf16.msra.mxu0 %v215_v7  ;;  %p297_p6 = pnand %p296_p5, %p290_p2 }
  0x2f   :  { %217 = vmatprep.subr.bf16.mxu0 %v321_v0 }
  0x32   :  { %219 = vmatpush3.bf16.msra.mxu0 %v218_v10 }
  0x33   :  { %220 = vmatprep.subr.bf16.mxu0 %v321_v0 }
  0x36   :  { %222 = vmatpush3.bf16.msra.mxu0 %v221_v13 }
  0x37   :  { %223 = vmatprep.subr.bf16.mxu0 %v321_v0 }
  0x3a   :  { %225 = vmatpush3.bf16.msra.mxu0 %v224_v16 }
  0x3b   :  { %226 = vmatprep.subr.bf16.mxu0 %v321_v0 }
  0x3e   :  { %228 = vmatpush3.bf16.msra.mxu0 %v227_v19 }
  0x3f   :  { %229 = vmatprep.subr.bf16.mxu0 %v321_v0 }
  0x42   :  { %231 = vmatpush3.bf16.msra.mxu0 %v230_v22 }
  0x43   :  { %232 = vmatprep.subr.bf16.mxu0 %v321_v0 }
  0x46   :  { %234 = vmatpush3.bf16.msra.mxu0 %v233_v25 }
  0x49   :  { %209 = vmatmul.mubr.f32.vlgmr.msra.gmra.mrb[0].mxu0 %v41_v26 }
 0x11c   :  { %v131_v28 = vpop.f32.mrb[0].mxu0 }
 0x11d   :  { %v132_v29 = vadd.f32 %v158_v27, %v131_v28  ;;  %v210_v30 = vpop.f32.mrb[1].mxu0 }
 0x11f   :  { %v136_v31 = vmul.f32 0.70710677, %v132_v29  ;;  %v135_v33 = vmul.f32 0.5, %v132_v29 }
 0x121   :  { %243 = verf.f32 %v136_v31 }
 0x12b   :  { %v244_v32 = vpop.eup %243 }
 0x12c   :  { %v138_v34 = vadd.f32 1.0, %v244_v32 }
 0x12e   :  { %v139_v35 = vmul.f32 %v138_v34, %v135_v33 }
 0x130   :  { %v140_v36 = vadd.f32 %v139_v35, %v41_v26 }
 0x132   :  { %141 = vst [vmem:[#allocation7] sm:$0xf] %v140_v36 }
 0x133   :  { %300 = shalt.err (!%p297_p6)
}
 0x134   :  { %s301_s15 = scalar_lea.hbm %s394_s3, 64 }
 0x135   :  { %p302_p7 = scmp.ne.s32.totalorder %s394_s3, %s301_s15  ;;  %p305_p8 = scmp.lt.u32.totalorder %s301_s15, %s394_s3 }
 0x137   :  { %p307_p9 = pnand %p305_p8, %p302_p7 }
 0x139   :  { %310 = shalt.err (!%p307_p9)
}
 0x13a   :  { %151 = dma.vmem_to_hbm [thread:$0]  %s149_s12, 64, %s394_s3, [#allocation4]  }
 0x13b   :  { %315 = dma.done.wait [#allocation4], 64  }
 0x13c   :  { %316 = vsyncadd [#allocation4], 4294967232 }
 0x13d   :  { %155 = vsyncpa [#allocation3], 1 }
 0x13e   :  { %156 = vsyncpa [#allocation6], 1 }
 0x13f   :  { %157 = vsyncpa [#allocation4], 1 }

</bundles_post_ra>
